<compile_context>
chip_gen: v7x
topology: tpu7x:2x2x1
jax: 0.10.0
libtpu: 0.0.40
codegen_flags: <defaults>
</compile_context>

<pallas_src>
import functools
import math

import jax
import jax.numpy as jnp
from jax import lax
from jax.experimental import pallas as pl
from jax.experimental.pallas import tpu as pltpu


def make_positional_encodings(dim_embedding: int, max_len: int) -> jnp.ndarray:
    """Deterministic sinusoidal table, shape (1, max_len, dim_embedding)."""
    if dim_embedding % 2 != 0:
        raise ValueError("dim_embedding must be even (sin/cos interleave).")
    positions = jnp.arange(0, max_len, dtype=jnp.float32)[:, None]           # (L, 1)
    scale = -(math.log(10000.0) / dim_embedding)
    arguments = jnp.exp(jnp.arange(0, dim_embedding, 2, dtype=jnp.float32) * scale)
    arguments = positions * arguments                                         # (L, D/2)
    pe = jnp.zeros((max_len, dim_embedding), dtype=jnp.float32)
    pe = pe.at[:, 0::2].set(jnp.sin(arguments))
    pe = pe.at[:, 1::2].set(jnp.cos(arguments))
    return pe[None, :, :]                                                     # (1, L, D)


# ----------------------------------------------------------------------------
# Kernels
# ----------------------------------------------------------------------------

def _pe_add_kernel(x_ref, pe_ref, o_ref):
    # Eval path: broadcast add in x's dtype (PE was pre-cast wrapper-side).
    o_ref[...] = x_ref[...] + pe_ref[...]


def _pe_add_dropout_kernel(seed_ref, x_ref, pe_ref, o_ref, *,
                           p: float, block_batch: int, block_seq: int,
                           seq_rows: int, dcol: int):
    # x_ref: (bc, ts, Dc), pe_ref: (1, ts, Dc).  Add in x's dtype.
    y = x_ref[...] + pe_ref[...]

    # --- inverted dropout via a portable counter-hash PRNG -------------------
    # Global element index in the (B, seq_rows, Dc) folded layout acts as the
    # counter, mixed with the seed.  All ops are 32-bit VPU integer ops, so
    # this lowers on TPU *and* in interpret mode (the hardware PRNG does not).
    # NOTE: counters wrap past 2^32 elements — irrelevant at practical sizes.
    b0 = (pl.program_id(1) * block_batch).astype(jnp.uint32)
    s0 = (pl.program_id(0) * block_seq).astype(jnp.uint32)
    bi = lax.broadcasted_iota(jnp.uint32, y.shape, 0) + b0
    si = lax.broadcasted_iota(jnp.uint32, y.shape, 1) + s0
    di = lax.broadcasted_iota(jnp.uint32, y.shape, 2)
    ctr = (bi * jnp.uint32(seq_rows) + si) * jnp.uint32(dcol) + di

    key = seed_ref[0].astype(jnp.uint32) * jnp.uint32(0x9E3779B9)   # seed mixing
    h = ctr ^ key
    # lowbias32 avalanche (Wang/xxhash-style): decorrelates consecutive counters.
    h = (h ^ (h >> 16)) * jnp.uint32(0x7FEB352D)
    h = (h ^ (h >> 15)) * jnp.uint32(0x846CA68B)
    h = h ^ (h >> 16)

    # keep with prob (1 - p): compare raw bits against an integer threshold.
    threshold = jnp.uint32(min(int(round(p * (2.0 ** 32))), 2 ** 32 - 1))
    keep = h >= threshold
    scale = jnp.asarray(1.0 / (1.0 - p), dtype=y.dtype)
    o_ref[...] = jnp.where(keep, y * scale, jnp.zeros((), dtype=y.dtype))

    # TODO(synk): training-mode dropout cannot bit-match torch's RNG stream;
    # keep-probability and 1/(1-p) scaling semantics do match nn.Dropout.


# ----------------------------------------------------------------------------
# Tiling helpers
# ----------------------------------------------------------------------------

def _choose_tiles(batch: int, seq_rows: int, dcol: int, itemsize: int,
                  target_bytes: int = 2 * 1024 * 1024):
    """Pick (batch_chunk, seq_tile) so one block is ~target_bytes.

    Batch is folded into the block (fewer grid steps, PE fetched once per seq
    tile); seq tiles are aligned to the dtype's sublane packing.
    """
    align = max(8, 32 // max(1, itemsize))       # 8 f32, 16 bf16, 32 int8/fp8
    row_bytes = max(1, dcol * itemsize)
    ts = target_bytes // max(1, batch * row_bytes)
    if ts >= seq_rows:
        return batch, seq_rows                   # whole (B, S) slab in one block
    if ts >= align:
        return batch, (ts // align) * align      # full batch, tiled seq
    # Batch alone exceeds the budget: chunk batch, minimal aligned seq tile.
    ts = min(seq_rows, align)
    bc = max(1, target_bytes // max(1, ts * row_bytes))
    return min(bc, batch), ts


def _lane_fold_factor(seq_len: int, dim: int) -> int:
    """Smallest k with (k*dim) % 128 == 0 and seq_len % k == 0, else 1."""
    if dim % 128 == 0:
        return 1
    k = math.lcm(dim, 128) // dim
    if k <= seq_len and seq_len % k == 0:
        return k
    return 1                                     # fall back to lane-masked stores


# ----------------------------------------------------------------------------
# Wrapper
# ----------------------------------------------------------------------------

def positional_encoding_forward(x, pos_enc, *, dropout_p=0.1, training=False, seed=0):
    """x: (B, S, D). pos_enc: (1, max_len, D) full table. Returns (B, S, D)."""
    B, S, D = x.shape
    assert pos_enc.shape[0] == 1 and pos_enc.shape[2] == D and pos_enc.shape[1] >= S
    assert 0.0 <= float(dropout_p) < 1.0

    # Slice to the used length and pre-cast the PE table to x's dtype (once).
    pe = pos_enc[:, :S, :].astype(x.dtype)

    # Lane-dense layout: fold k consecutive seq rows into the last dim so the
    # output stores are unmasked vst (biggest measured single lever for D<128).
    k = _lane_fold_factor(S, D)
    seq_rows, dcol = S // k, D * k
    x_r = x.reshape(B, seq_rows, dcol)
    pe_r = pe.reshape(1, seq_rows, dcol)

    bc, ts = _choose_tiles(B, seq_rows, dcol, x.dtype.itemsize)
    n_seq = pl.cdiv(seq_rows, ts)
    n_b = pl.cdiv(B, bc)

    itemsize = x.dtype.itemsize
    cost = pl.CostEstimate(
        flops=B * S * D,                                     # the broadcast add
        transcendentals=0,
        bytes_accessed=(2 * B * S * D + S * D) * itemsize,
    )
    cparams = pltpu.CompilerParams(
        dimension_semantics=("parallel", "parallel"),
        vmem_limit_bytes=32 * 1024 * 1024,
    )

    use_dropout = training and float(dropout_p) > 0.0
    if use_dropout:
        kernel = functools.partial(
            _pe_add_dropout_kernel, p=float(dropout_p),
            block_batch=bc, block_seq=ts, seq_rows=seq_rows, dcol=dcol)
        grid_spec = pltpu.PrefetchScalarGridSpec(
            num_scalar_prefetch=1,                           # seed lands in SMEM
            grid=(n_seq, n_b),                               # seq outer, batch inner
            in_specs=[
                pl.BlockSpec((bc, ts, dcol), lambda s, b, seed_ref: (b, s, 0)),  # x
                pl.BlockSpec((1, ts, dcol), lambda s, b, seed_ref: (0, s, 0)),   # pe
            ],
            out_specs=pl.BlockSpec((bc, ts, dcol), lambda s, b, seed_ref: (b, s, 0)),
        )
        args = (jnp.asarray([seed], dtype=jnp.int32), x_r, pe_r)
    else:
        # Inference path: no dead scalar-prefetch operand.
        kernel = _pe_add_kernel
        grid_spec = pl.GridSpec(
            grid=(n_seq, n_b),
            in_specs=[
                pl.BlockSpec((bc, ts, dcol), lambda s, b: (b, s, 0)),            # x
                pl.BlockSpec((1, ts, dcol), lambda s, b: (0, s, 0)),             # pe
            ],
            out_specs=pl.BlockSpec((bc, ts, dcol), lambda s, b: (b, s, 0)),
        )
        args = (x_r, pe_r)

    out = pl.pallas_call(
        kernel,
        out_shape=jax.ShapeDtypeStruct((B, seq_rows, dcol), x.dtype),
        grid_spec=grid_spec,
        compiler_params=cparams,
        cost_estimate=cost,
    )(*args)

    return out.reshape(B, S, D)


# ----------------------------------------------------------------------------

if __name__ == "__main__":
    # Small shapes consistent with the module: batch=2, seq=8, dim_embedding=32.
    B, S, D = 2, 8, 32
    MAX_LEN = 64
    DROPOUT_P = 0.1

    key = jax.random.PRNGKey(0)
    x = jax.random.normal(key, (B, S, D), dtype=jnp.float32)
    pos_enc = make_positional_encodings(D, MAX_LEN)

    # Pure-JAX reference of the eval-mode forward (dropout = identity).
    ref = x + pos_enc[:, :S, :]

    # Inference semantics (nn.Dropout is identity in eval mode).
    out = positional_encoding_forward(x, pos_enc, dropout_p=DROPOUT_P, training=False)
    out = jax.block_until_ready(out)
    assert out.shape == (B, S, D)
    assert jnp.allclose(out, ref, atol=1e-6), "eval-mode mismatch vs reference"

    # Training mode: every element must be either dropped (0) or (x+pe)/(1-p).
    out_tr = positional_encoding_forward(x, pos_enc, dropout_p=DROPOUT_P,
                                         training=True, seed=123)
    out_tr = jax.block_until_ready(out_tr)
    scaled = ref / (1.0 - DROPOUT_P)
    kept = jnp.isclose(out_tr, scaled, atol=1e-5, rtol=1e-5)
    dropped = jnp.abs(out_tr) <= 1e-6
    assert bool(jnp.all(kept | dropped)), "training-mode dropout semantics mismatch"

    # Determinism: same seed -> same mask.
    out_tr2 = positional_encoding_forward(x, pos_enc, dropout_p=DROPOUT_P,
                                          training=True, seed=123)
    assert jnp.array_equal(out_tr, jax.block_until_ready(out_tr2)), "non-deterministic dropout"

    print("KERNEL_OK")
</pallas_src>

<mosaic_0001>
module attributes {stable_mosaic.version = 11 : i64} {
  func.func @_pe_add_kernel(%arg0: i32, %arg1: i32, %arg2: memref<2x2x128xf32, #tpu.memory_space<vmem>>, %arg3: memref<1x2x128xf32, #tpu.memory_space<vmem>>, %arg4: memref<2x2x128xf32, #tpu.memory_space<vmem>>) attributes {dimension_semantics = [#tpu.dimension_semantics<parallel>, #tpu.dimension_semantics<parallel>], iteration_bounds = array<i64: 1, 1>, scalar_prefetch = 0 : i64, scratch_operands = 0 : i64, tpu.core_type = #tpu.core_type<tc>, window_params = [{transform_indices = @transform_0, window_bounds = array<i64: 2, 2, 128>}, {transform_indices = @transform_1, window_bounds = array<i64: 1, 2, 128>}, {transform_indices = @transform_2, window_bounds = array<i64: 2, 2, 128>}]} {
    %c0 = arith.constant 0 : index
    %c0_0 = arith.constant 0 : index
    %c0_1 = arith.constant 0 : index
    %0 = vector.load %arg2[%c0, %c0_0, %c0_1] : memref<2x2x128xf32, #tpu.memory_space<vmem>>, vector<2x2x128xf32>
    %c0_2 = arith.constant 0 : index
    %c0_3 = arith.constant 0 : index
    %c0_4 = arith.constant 0 : index
    %1 = vector.load %arg3[%c0_2, %c0_3, %c0_4] : memref<1x2x128xf32, #tpu.memory_space<vmem>>, vector<1x2x128xf32>
    %2 = vector.broadcast %1 : vector<1x2x128xf32> to vector<2x2x128xf32>
    %3 = arith.addf %0, %2 : vector<2x2x128xf32>
    %c0_5 = arith.constant 0 : index
    %c0_6 = arith.constant 0 : index
    %c0_7 = arith.constant 0 : index
    %4 = vector.load %arg4[%c0_5, %c0_6, %c0_7] : memref<2x2x128xf32, #tpu.memory_space<vmem>>, vector<2x2x128xf32>
    tpu.vector_store %arg4[%c0_5, %c0_6, %c0_7], %3 {strides = array<i32>} : memref<2x2x128xf32, #tpu.memory_space<vmem>>, vector<2x2x128xf32>,
    return
  }
  func.func @transform_0(%arg0: i32, %arg1: i32) -> (i32, i32, i32) {
    %c0_i32 = arith.constant 0 : i32
    %c0_i32_0 = arith.constant 0 : i32
    return %arg1, %arg0, %c0_i32 : i32, i32, i32
  }
  func.func @transform_1(%arg0: i32, %arg1: i32) -> (i32, i32, i32) {
    %c0_i32 = arith.constant 0 : i32
    %c0_i32_0 = arith.constant 0 : i32
    %c0_i32_1 = arith.constant 0 : i32
    return %c0_i32, %arg0, %c0_i32_0 : i32, i32, i32
  }
  func.func @transform_2(%arg0: i32, %arg1: i32) -> (i32, i32, i32) {
    %c0_i32 = arith.constant 0 : i32
    %c0_i32_0 = arith.constant 0 : i32
    return %arg1, %arg0, %c0_i32 : i32, i32, i32
  }
}

</mosaic_0001>

<bundles_post_ra>
// kernel: tpu_custom_call.1
= control target key start
LH: loop header
LB: loop body
LE: loop exit
PB: predicated region body
PF: predicated region fallthrough
CT: control target
= control target key end

     0   :  { %7 = vsyncpa [#allocation3], 0  ;;  %s154_s0 = inlined_call_operand.hbm [shape: f32[2,2,128], index: 0, kind: input, shape index: {}]   ;;  %s155_s1 = inlined_call_operand.vmem [shape: f32[1,2,128], index: 1, kind: input, shape index: {}]   ;;  %s156_s2 = inlined_call_operand.hbm [shape: f32[2,2,128], index: 2, kind: output, shape index: {}]  }
   0x1   :  { %8 = vsyncpa [#allocation4], 0  ;;  %s102_s9 = smov [#allocation2]   ;;  %s54_s13 = scalar_lea.hbm %s154_s0, 64 }
   0x2   :  { %s14_s10 = sshll.u32 %s102_s9, 4  ;;  %p55_p0 = scmp.ne.s32.totalorder %s154_s0, %s54_s13  ;;  %s15_s10 = int_to_ptr.vmem [resolvable:$true] %s14_s10 }
   0x3   :  { %p58_p1 = scmp.lt.u32.totalorder %s54_s13, %s154_s0 }
   0x5   :  { %p60_p2 = pnand %p58_p1, %p55_p0 }
   0x7   :  { %63 = shalt.err (!%p60_p2)
}
   0x8   :  { %s64_s18 = scalar_lea.vmem %s15_s10, 64  ;;  %p69_p4 = scmp.lt.s32.totalorder %s15_s10, %s15_s10 }
   0x9   :  { %p65_p3 = scmp.ne.s32.totalorder %s15_s10, %s64_s18  ;;  %p70_p5 = scmp.lt.s32.totalorder %s64_s18, %s64_s18 }
   0xb   :  { %p71_p6 = por %p70_p5, %p69_p4 }
   0xd   :  { %p72_p7 = pnand %p71_p6, %p65_p3 }
   0xf   :  { %75 = shalt.err (!%p72_p7)
}
  0x10   :  { %s103_s19 = smov 32   ;;  %s104_s20 = smov 2  }
  0x11   :  { %20 = dma.hbm_to_vmem [thread:$0]  %s154_s0, 64, %s15_s10, [#allocation3], %s103_s19, %s103_s19, %s104_s20  }
  0x12   :  { %98 = dma.done.wait [#allocation3], 64  }
  0x13   :  { %99 = vsyncadd [#allocation3], 4294967232  ;;  %s105_s23 = smov [#allocation5]   ;;  %v26_v0 = vld [vmem:[#allocation2] sm:$0x3] }
  0x14   :  { %s38_s24 = sshll.u32 %s105_s23, 4  ;;  %v28_v1 = vld [vmem:[%s155_s1] sm:$0x3]  ;;  %v27_v2 = vld [vmem:[#allocation2 + $0x2] sm:$0x3]  ;;  %s39_s24 = int_to_ptr.vmem [resolvable:$true] %s38_s24 }
  0x15   :  { %v29_v3 = vadd.f32 %v28_v1, %v26_v0  ;;  %v30_v4 = vadd.f32 %v28_v1, %v27_v2  ;;  %s76_s27 = scalar_lea.vmem %s39_s24, 64  ;;  %p81_p9 = scmp.lt.s32.totalorder %s39_s24, %s39_s24 }
  0x16   :  { %p77_p8 = scmp.ne.s32.totalorder %s39_s24, %s76_s27  ;;  %p82_p10 = scmp.lt.s32.totalorder %s76_s27, %s76_s27 }
  0x17   :  { %31 = vst [vmem:[#allocation5] sm:$0x3] %v29_v3  ;;  %32 = vst [vmem:[#allocation5 + $0x2] sm:$0x3] %v30_v4 }
  0x18   :  { %p83_p11 = por %p82_p10, %p81_p9 }
  0x1a   :  { %p84_p12 = pnand %p83_p11, %p77_p8 }
  0x1c   :  { %87 = shalt.err (!%p84_p12)
}
  0x1d   :  { %s88_s29 = scalar_lea.hbm %s156_s2, 64 }
  0x1e   :  { %p89_p13 = scmp.ne.s32.totalorder %s156_s2, %s88_s29  ;;  %p92_p0 = scmp.lt.u32.totalorder %s88_s29, %s156_s2 }
  0x20   :  { %p94_p1 = pnand %p92_p0, %p89_p13 }
  0x22   :  { %97 = shalt.err (!%p94_p1)
}
  0x23   :  { %44 = dma.vmem_to_hbm [thread:$0]  %s39_s24, 64, %s156_s2, [#allocation4], %s103_s19, %s103_s19, %s104_s20  }
  0x24   :  { %100 = dma.done.wait [#allocation4], 64  }
  0x25   :  { %101 = vsyncadd [#allocation4], 4294967232 }
  0x26   :  { %48 = vsyncpa [#allocation3], 1 }
  0x27   :  { %49 = vsyncpa [#allocation4], 1 }

</bundles_post_ra>
